<compile_context>
chip_gen: v7x
topology: tpu7x:2x2x1
jax: 0.10.0
libtpu: 0.0.40
codegen_flags: <defaults>
</compile_context>

<pallas_src>
import jax
import jax.numpy as jnp
import numpy as np
from jax.experimental import pallas as pl
from jax.experimental.pallas import tpu as pltpu


def basic_block_kernel(x_ref, w1_ref, w2_ref, up_ref, dn_ref,
                       s1_ref, t1_ref, s2_ref, t2_ref, o_ref):
    x = x_ref[0].astype(jnp.float32)      # (M, L) row-pair slab, L = 2*W*C
    sh_up = up_ref[...]                   # (M, M) bf16: row r <- row r-1 (0 at image starts)
    sh_dn = dn_ref[...]                   # (M, M) bf16: row r <- row r+1 (0 at image ends)

    def conv3x3(a_f32, w_ref):
        # 3x3 "SAME" conv on the row-pair slab:
        #   out[r] = a[r-1] @ M_up + a[r] @ M_mid + a[r+1] @ M_dn
        # The three bands are stacked along K in w_ref; the shifted copies come from
        # the tiny banded shift matmuls (boundary zeroing baked into sh_up / sh_dn,
        # so batch folding into M needs no in-kernel masking).
        a = a_f32.astype(jnp.bfloat16)
        a_up = jnp.dot(sh_up, a, preferred_element_type=jnp.float32).astype(jnp.bfloat16)
        a_dn = jnp.dot(sh_dn, a, preferred_element_type=jnp.float32).astype(jnp.bfloat16)
        a_cat = jnp.concatenate([a_up, a, a_dn], axis=1)        # (M, 3L), lane-aligned
        return jnp.dot(a_cat, w_ref[...], preferred_element_type=jnp.float32)

    a1 = jnp.maximum(x * s1_ref[...] + t1_ref[...], 0.0)        # BN1 (folded) + ReLU
    c1 = conv3x3(a1, w1_ref)
    a2 = jnp.maximum(c1 * s2_ref[...] + t2_ref[...], 0.0)       # BN2 (folded) + ReLU
    c2 = conv3x3(a2, w2_ref)
    o_ref[0] = (c2 + x).astype(o_ref.dtype)                     # identity residual


def _paired_conv_matrix(w_hwio, W):
    """(3,3,Cin,Cout) HWIO filter -> (3*2*W*Cin, 2*W*Cout) stacked band matrix.

    Lane index of the row-pair slab is p*W*C + w*C + c (p = row within the pair).
    Returns vstack([M_up, M_mid, M_dn]) so that
        out_pair[r] = prev_pair @ M_up + pair @ M_mid + next_pair @ M_dn
    implements the 3x3 cross-correlation with implicit zero padding over width
    (Toeplitz band) and the intra-/cross-pair height taps in the 2x2 block structure.
    Pure parameter reorganization, done once in the wrapper.
    """
    KH, KW, Cin, Cout = w_hwio.shape
    wi = jnp.arange(W)
    dw = wi[:, None] - wi[None, :]                        # w_in - w_out
    kx = jnp.clip(dw + 1, 0, KW - 1)
    valid = (jnp.abs(dw) <= 1).astype(w_hwio.dtype)
    t = w_hwio[:, kx] * valid[None, :, :, None, None]     # (KH, Win, Wout, Cin, Cout)
    t = t.transpose(0, 1, 3, 2, 4).reshape(KH, W * Cin, W * Cout)   # T[ky], (WC, WC)
    z = jnp.zeros_like(t[0])
    m_up = jnp.block([[z, z], [t[0], z]])                 # (p_in=1 -> p_out=0), ky=0
    m_mid = jnp.block([[t[1], t[0]], [t[2], t[1]]])       # within-pair taps
    m_dn = jnp.block([[z, t[2]], [z, z]])                 # (p_in=0 -> p_out=1), ky=2
    return jnp.concatenate([m_up, m_mid, m_dn], axis=0)   # (3*2WC, 2WC)


def _pair_shift_matrices(M, rows_per_image):
    """Banded (M, M) 0/1 shift matrices; zero rows at image boundaries (batch folded into M)."""
    r = np.arange(M)
    up = (r[:, None] == r[None, :] + 1) & (r[:, None] % rows_per_image != 0)
    dn = (r[:, None] == r[None, :] - 1) & (r[:, None] % rows_per_image != rows_per_image - 1)
    return jnp.asarray(up, jnp.bfloat16), jnp.asarray(dn, jnp.bfloat16)


def _detect_num_tensorcores():
    # v7x has 2 TensorCores per chip ("parallel" grid axes are sharded across them);
    # v5e / v6e have 1, so a single grid step avoids per-step overhead.
    try:
        info = pltpu.get_tpu_info()
    except Exception:
        return 1
    for name in ("num_cores", "core_count", "num_tensorcores", "tensorcore_count"):
        v = getattr(info, name, None)
        if isinstance(v, int) and v > 0:
            return v
    return 1


def basic_block_pallas(x_nhwc, w1, w2, scale1, shift1, scale2, shift2, num_chunks=None):
    N, H, W, C = x_nhwc.shape
    Cout = w1.shape[-1]
    assert Cout == C, "identity residual requires inplanes == planes"
    assert H % 2 == 0, "row-pair lane folding needs an even height"
    Hp = H // 2
    L = 2 * W * C                                          # 128 lanes for W=16, C=4

    if num_chunks is None:
        cores = _detect_num_tensorcores()
        num_chunks = cores if (cores > 1 and N % cores == 0) else 1
    assert N % num_chunks == 0
    M = (N // num_chunks) * Hp                             # batch folded into matmul M dim

    # Layout plumbing (contiguous reshapes) + parameter glue, all outside the kernel.
    x3d = x_nhwc.reshape(num_chunks, M, L).astype(jnp.bfloat16)      # bf16 HBM<->VMEM
    wc1 = _paired_conv_matrix(w1, W).astype(jnp.bfloat16)            # (3L, L)
    wc2 = _paired_conv_matrix(w2, W).astype(jnp.bfloat16)
    sh_up, sh_dn = _pair_shift_matrices(M, Hp)
    s1 = jnp.tile(scale1.astype(jnp.float32), 2 * W).reshape(1, L)
    t1 = jnp.tile(shift1.astype(jnp.float32), 2 * W).reshape(1, L)
    s2 = jnp.tile(scale2.astype(jnp.float32), 2 * W).reshape(1, L)
    t2 = jnp.tile(shift2.astype(jnp.float32), 2 * W).reshape(1, L)

    out3d = pl.pallas_call(
        basic_block_kernel,
        out_shape=jax.ShapeDtypeStruct((num_chunks, M, L), jnp.float32),
        grid_spec=pltpu.PrefetchScalarGridSpec(
            num_scalar_prefetch=0,
            grid=(num_chunks,),
            in_specs=[
                pl.BlockSpec((1, M, L), lambda n: (n, 0, 0)),    # activation slab chunk
                pl.BlockSpec((3 * L, L), lambda n: (0, 0)),      # conv1 stacked band matrix
                pl.BlockSpec((3 * L, L), lambda n: (0, 0)),      # conv2 stacked band matrix
                pl.BlockSpec((M, M), lambda n: (0, 0)),          # row-pair shift up
                pl.BlockSpec((M, M), lambda n: (0, 0)),          # row-pair shift down
                pl.BlockSpec((1, L), lambda n: (0, 0)),          # bn1 scale (lane-tiled)
                pl.BlockSpec((1, L), lambda n: (0, 0)),          # bn1 shift
                pl.BlockSpec((1, L), lambda n: (0, 0)),          # bn2 scale
                pl.BlockSpec((1, L), lambda n: (0, 0)),          # bn2 shift
            ],
            out_specs=pl.BlockSpec((1, M, L), lambda n: (n, 0, 0)),
        ),
        compiler_params=pltpu.CompilerParams(
            dimension_semantics=("parallel",)),
    )(x3d, wc1, wc2, sh_up, sh_dn, s1, t1, s2, t2)
    return out3d.reshape(N, H, W, C)


def basic_block(x_nchw, params):
    """Mirrors BasicBlock.forward (inference-mode BN) with PyTorch NCHW input."""
    eps = 1e-5
    (g1, b1, m1, v1, w1, g2, b2, m2, v2, w2) = params
    # fold BN (inference, running stats) into per-channel scale/shift
    s1 = g1 / jnp.sqrt(v1 + eps)
    t1 = b1 - m1 * s1
    s2 = g2 / jnp.sqrt(v2 + eps)
    t2 = b2 - m2 * s2
    x_nhwc = jnp.transpose(x_nchw, (0, 2, 3, 1)).astype(jnp.float32)
    y_nhwc = basic_block_pallas(x_nhwc, w1, w2, s1, t1, s2, t2)
    return jnp.transpose(y_nhwc, (0, 3, 1, 2))             # back to NCHW


def reference_nhwc(x, w1, w2, s1, t1, s2, t2):
    a1 = jnp.maximum(x * s1.reshape(1, 1, 1, -1) + t1.reshape(1, 1, 1, -1), 0.0)
    c1 = jax.lax.conv_general_dilated(a1, w1, (1, 1), "SAME",
                                      dimension_numbers=("NHWC", "HWIO", "NHWC"))
    a2 = jnp.maximum(c1 * s2.reshape(1, 1, 1, -1) + t2.reshape(1, 1, 1, -1), 0.0)
    c2 = jax.lax.conv_general_dilated(a2, w2, (1, 1), "SAME",
                                      dimension_numbers=("NHWC", "HWIO", "NHWC"))
    return c2 + x


if __name__ == "__main__":
    # small shapes consistent with the module: inplanes = planes = 4, stride=1, no downsample
    N, C, H, W = 2, 4, 16, 16
    key = jax.random.PRNGKey(0)
    ks = jax.random.split(key, 11)

    x_nchw = jax.random.normal(ks[0], (N, C, H, W), jnp.float32)

    # deterministic synthetic parameters (shapes from BasicBlock.__init__)
    g1 = 1.0 + 0.1 * jax.random.normal(ks[1], (C,), jnp.float32)
    b1 = 0.1 * jax.random.normal(ks[2], (C,), jnp.float32)
    m1 = 0.1 * jax.random.normal(ks[3], (C,), jnp.float32)
    v1 = 0.5 + jnp.abs(jax.random.normal(ks[4], (C,), jnp.float32))
    w1 = 0.2 * jax.random.normal(ks[5], (3, 3, C, C), jnp.float32)   # HWIO
    g2 = 1.0 + 0.1 * jax.random.normal(ks[6], (C,), jnp.float32)
    b2 = 0.1 * jax.random.normal(ks[7], (C,), jnp.float32)
    m2 = 0.1 * jax.random.normal(ks[8], (C,), jnp.float32)
    v2 = 0.5 + jnp.abs(jax.random.normal(ks[9], (C,), jnp.float32))
    w2 = 0.2 * jax.random.normal(ks[10], (3, 3, C, C), jnp.float32)  # HWIO

    params = (g1, b1, m1, v1, w1, g2, b2, m2, v2, w2)

    y = basic_block(x_nchw, params)
    y = jax.block_until_ready(y)

    # cross-check against a pure-JAX reference (same folded-BN inference semantics);
    # tolerance covers the bf16 activation transfer and bf16 matmul operands (f32 accum).
    eps = 1e-5
    s1 = g1 / jnp.sqrt(v1 + eps); t1 = b1 - m1 * s1
    s2 = g2 / jnp.sqrt(v2 + eps); t2 = b2 - m2 * s2
    x_nhwc = jnp.transpose(x_nchw, (0, 2, 3, 1))
    y_ref = jnp.transpose(reference_nhwc(x_nhwc, w1, w2, s1, t1, s2, t2), (0, 3, 1, 2))
    np.testing.assert_allclose(np.asarray(y), np.asarray(y_ref), rtol=5e-2, atol=5e-2)

    print("KERNEL_OK")
</pallas_src>

<mosaic_0001>
module attributes {stable_mosaic.version = 11 : i64} {
  func.func @basic_block_kernel(%arg0: i32, %arg1: memref<1x16x128xbf16, #tpu.memory_space<vmem>>, %arg2: memref<384x128xbf16, #tpu.memory_space<vmem>>, %arg3: memref<384x128xbf16, #tpu.memory_space<vmem>>, %arg4: memref<16x16xbf16, #tpu.memory_space<vmem>>, %arg5: memref<16x16xbf16, #tpu.memory_space<vmem>>, %arg6: memref<1x128xf32, #tpu.memory_space<vmem>>, %arg7: memref<1x128xf32, #tpu.memory_space<vmem>>, %arg8: memref<1x128xf32, #tpu.memory_space<vmem>>, %arg9: memref<1x128xf32, #tpu.memory_space<vmem>>, %arg10: memref<1x16x128xf32, #tpu.memory_space<vmem>>) attributes {dimension_semantics = [#tpu.dimension_semantics<parallel>], iteration_bounds = array<i64: 1>, scalar_prefetch = 0 : i64, scratch_operands = 0 : i64, tpu.core_type = #tpu.core_type<tc>, window_params = [{transform_indices = @transform_0, window_bounds = array<i64: 1, 16, 128>}, {pipeline_mode = #tpu.pipeline_mode<synchronous>, transform_indices = @transform_1, window_bounds = array<i64: 384, 128>}, {pipeline_mode = #tpu.pipeline_mode<synchronous>, transform_indices = @transform_2, window_bounds = array<i64: 384, 128>}, {pipeline_mode = #tpu.pipeline_mode<synchronous>, transform_indices = @transform_3, window_bounds = array<i64: 16, 16>}, {pipeline_mode = #tpu.pipeline_mode<synchronous>, transform_indices = @transform_4, window_bounds = array<i64: 16, 16>}, {pipeline_mode = #tpu.pipeline_mode<synchronous>, transform_indices = @transform_5, window_bounds = array<i64: 1, 128>}, {pipeline_mode = #tpu.pipeline_mode<synchronous>, transform_indices = @transform_6, window_bounds = array<i64: 1, 128>}, {pipeline_mode = #tpu.pipeline_mode<synchronous>, transform_indices = @transform_7, window_bounds = array<i64: 1, 128>}, {pipeline_mode = #tpu.pipeline_mode<synchronous>, transform_indices = @transform_8, window_bounds = array<i64: 1, 128>}, {transform_indices = @transform_9, window_bounds = array<i64: 1, 16, 128>}]} {
    %c0 = arith.constant 0 : index
    %c0_0 = arith.constant 0 : index
    %c0_1 = arith.constant 0 : index
    %0 = vector.load %arg1[%c0, %c0_0, %c0_1] : memref<1x16x128xbf16, #tpu.memory_space<vmem>>, vector<1x16x128xbf16>
    %1 = vector.shape_cast %0 : vector<1x16x128xbf16> to vector<16x128xbf16>
    %2 = arith.extf %1 : vector<16x128xbf16> to vector<16x128xf32>
    %c0_2 = arith.constant 0 : index
    %c0_3 = arith.constant 0 : index
    %3 = vector.load %arg4[%c0_2, %c0_3] : memref<16x16xbf16, #tpu.memory_space<vmem>>, vector<16x16xbf16>
    %c0_4 = arith.constant 0 : index
    %c0_5 = arith.constant 0 : index
    %4 = vector.load %arg5[%c0_4, %c0_5] : memref<16x16xbf16, #tpu.memory_space<vmem>>, vector<16x16xbf16>
    %c0_6 = arith.constant 0 : index
    %c0_7 = arith.constant 0 : index
    %5 = vector.load %arg6[%c0_6, %c0_7] : memref<1x128xf32, #tpu.memory_space<vmem>>, vector<1x128xf32>
    %6 = vector.broadcast %5 : vector<1x128xf32> to vector<16x128xf32>
    %7 = arith.mulf %2, %6 : vector<16x128xf32>
    %c0_8 = arith.constant 0 : index
    %c0_9 = arith.constant 0 : index
    %8 = vector.load %arg7[%c0_8, %c0_9] : memref<1x128xf32, #tpu.memory_space<vmem>>, vector<1x128xf32>
    %9 = vector.broadcast %8 : vector<1x128xf32> to vector<16x128xf32>
    %10 = arith.addf %7, %9 : vector<16x128xf32>
    %cst = arith.constant 0.000000e+00 : f32
    %11 = vector.broadcast %cst : f32 to vector<16x128xf32>
    %12 = arith.maximumf %10, %11 : vector<16x128xf32>
    %13 = arith.truncf %12 : vector<16x128xf32> to vector<16x128xbf16>
    %cst_10 = arith.constant dense<0.000000e+00> : vector<16x128xf32>
    %14 = tpu.matmul %3, %13, %cst_10 {dimension_numbers = #tpu.dot_dimension_numbers<[1], [0], [0], [1], [0, 0, 1, 1], [], []>} : vector<16x16xbf16>, vector<16x128xbf16>, vector<16x128xf32> -> vector<16x128xf32>
    %15 = arith.truncf %14 : vector<16x128xf32> to vector<16x128xbf16>
    %cst_11 = arith.constant dense<0.000000e+00> : vector<16x128xf32>
    %16 = tpu.matmul %4, %13, %cst_11 {dimension_numbers = #tpu.dot_dimension_numbers<[1], [0], [0], [1], [0, 0, 1, 1], [], []>} : vector<16x16xbf16>, vector<16x128xbf16>, vector<16x128xf32> -> vector<16x128xf32>
    %17 = arith.truncf %16 : vector<16x128xf32> to vector<16x128xbf16>
    %18 = tpu.concatenate %15, %13, %17 in 1 : vector<16x128xbf16>, vector<16x128xbf16>, vector<16x128xbf16> -> vector<16x384xbf16>
    %c0_12 = arith.constant 0 : index
    %c0_13 = arith.constant 0 : index
    %19 = vector.load %arg2[%c0_12, %c0_13] : memref<384x128xbf16, #tpu.memory_space<vmem>>, vector<384x128xbf16>
    %cst_14 = arith.constant dense<0.000000e+00> : vector<16x128xf32>
    %20 = tpu.matmul %18, %19, %cst_14 {dimension_numbers = #tpu.dot_dimension_numbers<[1], [0], [0], [1], [0, 0, 1, 1], [], []>} : vector<16x384xbf16>, vector<384x128xbf16>, vector<16x128xf32> -> vector<16x128xf32>
    %c0_15 = arith.constant 0 : index
    %c0_16 = arith.constant 0 : index
    %21 = vector.load %arg8[%c0_15, %c0_16] : memref<1x128xf32, #tpu.memory_space<vmem>>, vector<1x128xf32>
    %22 = vector.broadcast %21 : vector<1x128xf32> to vector<16x128xf32>
    %23 = arith.mulf %20, %22 : vector<16x128xf32>
    %c0_17 = arith.constant 0 : index
    %c0_18 = arith.constant 0 : index
    %24 = vector.load %arg9[%c0_17, %c0_18] : memref<1x128xf32, #tpu.memory_space<vmem>>, vector<1x128xf32>
    %25 = vector.broadcast %24 : vector<1x128xf32> to vector<16x128xf32>
    %26 = arith.addf %23, %25 : vector<16x128xf32>
    %cst_19 = arith.constant 0.000000e+00 : f32
    %27 = vector.broadcast %cst_19 : f32 to vector<16x128xf32>
    %28 = arith.maximumf %26, %27 : vector<16x128xf32>
    %29 = arith.truncf %28 : vector<16x128xf32> to vector<16x128xbf16>
    %cst_20 = arith.constant dense<0.000000e+00> : vector<16x128xf32>
    %30 = tpu.matmul %3, %29, %cst_20 {dimension_numbers = #tpu.dot_dimension_numbers<[1], [0], [0], [1], [0, 0, 1, 1], [], []>} : vector<16x16xbf16>, vector<16x128xbf16>, vector<16x128xf32> -> vector<16x128xf32>
    %31 = arith.truncf %30 : vector<16x128xf32> to vector<16x128xbf16>
    %cst_21 = arith.constant dense<0.000000e+00> : vector<16x128xf32>
    %32 = tpu.matmul %4, %29, %cst_21 {dimension_numbers = #tpu.dot_dimension_numbers<[1], [0], [0], [1], [0, 0, 1, 1], [], []>} : vector<16x16xbf16>, vector<16x128xbf16>, vector<16x128xf32> -> vector<16x128xf32>
    %33 = arith.truncf %32 : vector<16x128xf32> to vector<16x128xbf16>
    %34 = tpu.concatenate %31, %29, %33 in 1 : vector<16x128xbf16>, vector<16x128xbf16>, vector<16x128xbf16> -> vector<16x384xbf16>
    %c0_22 = arith.constant 0 : index
    %c0_23 = arith.constant 0 : index
    %35 = vector.load %arg3[%c0_22, %c0_23] : memref<384x128xbf16, #tpu.memory_space<vmem>>, vector<384x128xbf16>
    %cst_24 = arith.constant dense<0.000000e+00> : vector<16x128xf32>
    %36 = tpu.matmul %34, %35, %cst_24 {dimension_numbers = #tpu.dot_dimension_numbers<[1], [0], [0], [1], [0, 0, 1, 1], [], []>} : vector<16x384xbf16>, vector<384x128xbf16>, vector<16x128xf32> -> vector<16x128xf32>
    %37 = arith.addf %36, %2 : vector<16x128xf32>
    %c0_25 = arith.constant 0 : index
    %c0_26 = arith.constant 0 : index
    %c0_27 = arith.constant 0 : index
    %38 = vector.load %arg10[%c0_25, %c0_26, %c0_27] : memref<1x16x128xf32, #tpu.memory_space<vmem>>, vector<1x16x128xf32>
    %39 = vector.shape_cast %38 : vector<1x16x128xf32> to vector<16x128xf32>
    %40 = vector.shape_cast %37 : vector<16x128xf32> to vector<1x16x128xf32>
    tpu.vector_store %arg10[%c0_25, %c0_26, %c0_27], %40 {strides = array<i32>} : memref<1x16x128xf32, #tpu.memory_space<vmem>>, vector<1x16x128xf32>,
    return
  }
  func.func @transform_0(%arg0: i32) -> (i32, i32, i32) {
    %c0_i32 = arith.constant 0 : i32
    %c0_i32_0 = arith.constant 0 : i32
    %c0_i32_1 = arith.constant 0 : i32
    return %arg0, %c0_i32, %c0_i32_0 : i32, i32, i32
  }
  func.func @transform_1(%arg0: i32) -> (i32, i32) {
    %c0_i32 = arith.constant 0 : i32
    %c0_i32_0 = arith.constant 0 : i32
    %c0_i32_1 = arith.constant 0 : i32
    return %c0_i32, %c0_i32_0 : i32, i32
  }
  func.func @transform_2(%arg0: i32) -> (i32, i32) {
    %c0_i32 = arith.constant 0 : i32
    %c0_i32_0 = arith.constant 0 : i32
    %c0_i32_1 = arith.constant 0 : i32
    return %c0_i32, %c0_i32_0 : i32, i32
  }
  func.func @transform_3(%arg0: i32) -> (i32, i32) {
    %c0_i32 = arith.constant 0 : i32
    %c0_i32_0 = arith.constant 0 : i32
    %c0_i32_1 = arith.constant 0 : i32
    return %c0_i32, %c0_i32_0 : i32, i32
  }
  func.func @transform_4(%arg0: i32) -> (i32, i32) {
    %c0_i32 = arith.constant 0 : i32
    %c0_i32_0 = arith.constant 0 : i32
    %c0_i32_1 = arith.constant 0 : i32
    return %c0_i32, %c0_i32_0 : i32, i32
  }
  func.func @transform_5(%arg0: i32) -> (i32, i32) {
    %c0_i32 = arith.constant 0 : i32
    %c0_i32_0 = arith.constant 0 : i32
    %c0_i32_1 = arith.constant 0 : i32
    return %c0_i32, %c0_i32_0 : i32, i32
  }
  func.func @transform_6(%arg0: i32) -> (i32, i32) {
    %c0_i32 = arith.constant 0 : i32
    %c0_i32_0 = arith.constant 0 : i32
    %c0_i32_1 = arith.constant 0 : i32
    return %c0_i32, %c0_i32_0 : i32, i32
  }
  func.func @transform_7(%arg0: i32) -> (i32, i32) {
    %c0_i32 = arith.constant 0 : i32
    %c0_i32_0 = arith.constant 0 : i32
    %c0_i32_1 = arith.constant 0 : i32
    return %c0_i32, %c0_i32_0 : i32, i32
  }
  func.func @transform_8(%arg0: i32) -> (i32, i32) {
    %c0_i32 = arith.constant 0 : i32
    %c0_i32_0 = arith.constant 0 : i32
    %c0_i32_1 = arith.constant 0 : i32
    return %c0_i32, %c0_i32_0 : i32, i32
  }
  func.func @transform_9(%arg0: i32) -> (i32, i32, i32) {
    %c0_i32 = arith.constant 0 : i32
    %c0_i32_0 = arith.constant 0 : i32
    %c0_i32_1 = arith.constant 0 : i32
    return %arg0, %c0_i32, %c0_i32_0 : i32, i32, i32
  }
}

</mosaic_0001>

<bundles_post_ra>
// kernel: tpu_custom_call.1
= control target key start
LH: loop header
LB: loop body
LE: loop exit
PB: predicated region body
PF: predicated region fallthrough
CT: control target
= control target key end

     0   :  { %14 = vsyncpa [#allocation3], 0  ;;  %s1486_s0 = inlined_call_operand.hbm [shape: bf16[1,16,128], index: 0, kind: input, shape index: {}]   ;;  %s1487_s1 = inlined_call_operand.hbm [shape: bf16[384,128], index: 1, kind: input, shape index: {}]   ;;  %s1488_s2 = inlined_call_operand.hbm [shape: bf16[384,128], index: 2, kind: input, shape index: {}]   ;;  %s1489_s3 = inlined_call_operand.vmem [shape: bf16[16,16], index: 3, kind: input, shape index: {}]   ;;  %s1490_s4 = inlined_call_operand.hbm [shape: bf16[16,16], index: 4, kind: input, shape index: {}]   ;;  %s1491_s5 = inlined_call_operand.vmem [shape: f32[1,128], index: 5, kind: input, shape index: {}]   ;;  %s1492_s6 = inlined_call_operand.vmem [shape: f32[1,128], index: 6, kind: input, shape index: {}]   ;;  %s1493_s7 = inlined_call_operand.vmem [shape: f32[1,128], index: 7, kind: input, shape index: {}]   ;;  %s1494_s8 = inlined_call_operand.vmem [shape: f32[1,128], index: 8, kind: input, shape index: {}]   ;;  %s1495_s9 = inlined_call_operand.hbm [shape: f32[1,16,128], index: 9, kind: output, shape index: {}]  }
   0x1   :  { %15 = vsyncpa [#allocation6], 0 }
   0x2   :  { %16 = vsyncpa [#allocation9], 0 }
   0x3   :  { %17 = vsyncpa [#allocation4], 0  ;;  %s1268_s30 = smov [#allocation5]   ;;  %s1269_s11 = smov [#allocation2]  }
   0x4   :  { %s35_s10 = sshll.u32 %s1268_s30, 4  ;;  %s23_s12 = sshll.u32 %s1269_s11, 4  ;;  %s36_s10 = int_to_ptr.vmem [resolvable:$true] %s35_s10  ;;  %s1329_s12 = int_to_ptr.vmem [resolvable:$true] %s23_s12 }
   0x5   :  { %s1150_s15 = scalar_lea.hbm %s1487_s1, 3072 }
   0x6   :  { %p1151_p0 = scmp.ne.s32.totalorder %s1487_s1, %s1150_s15  ;;  %p1154_p1 = scmp.lt.u32.totalorder %s1150_s15, %s1487_s1 }
   0x8   :  { %p1156_p2 = pnand %p1154_p1, %p1151_p0 }
   0xa   :  { %1159 = shalt.err (!%p1156_p2)
}
   0xb   :  { %s1160_s20 = scalar_lea.vmem %s36_s10, 3072  ;;  %p1165_p4 = scmp.lt.s32.totalorder %s36_s10, %s36_s10 }
   0xc   :  { %p1161_p3 = scmp.ne.s32.totalorder %s36_s10, %s1160_s20  ;;  %p1166_p5 = scmp.lt.s32.totalorder %s1160_s20, %s1160_s20 }
   0xe   :  { %p1167_p6 = por %p1166_p5, %p1165_p4 }
  0x10   :  { %p1168_p7 = pnand %p1167_p6, %p1161_p3 }
  0x12   :  { %1171 = shalt.err (!%p1168_p7)
}
  0x13   :  { %s1270_s21 = smov 64   ;;  %s1271_s22 = smov 4  }
  0x14   :  { %41 = dma.hbm_to_vmem [thread:$0]  %s1487_s1, 3072, %s36_s10, [#allocation6], %s1270_s21, %s1270_s21, %s1271_s22  }
  0x15   :  { %s1172_s27 = scalar_lea.hbm %s1486_s0, 128 }
  0x16   :  { %p1173_p8 = scmp.ne.s32.totalorder %s1486_s0, %s1172_s27  ;;  %p1176_p9 = scmp.lt.u32.totalorder %s1172_s27, %s1486_s0 }
  0x18   :  { %p1178_p10 = pnand %p1176_p9, %p1173_p8 }
  0x1a   :  { %1181 = shalt.err (!%p1178_p10)
}
  0x1b   :  { %s1182_s13 = scalar_lea.vmem %s1329_s12, 128  ;;  %p1187_p12 = scmp.lt.s32.totalorder %s1329_s12, %s1329_s12 }
  0x1c   :  { %p1183_p11 = scmp.ne.s32.totalorder %s1329_s12, %s1182_s13  ;;  %p1188_p13 = scmp.lt.s32.totalorder %s1182_s13, %s1182_s13 }
  0x1e   :  { %p1189_p0 = por %p1188_p13, %p1187_p12 }
  0x20   :  { %p1190_p1 = pnand %p1189_p0, %p1183_p11 }
  0x22   :  { %1193 = shalt.err (!%p1190_p1)
}
  0x23   :  { %29 = dma.hbm_to_vmem [thread:$0]  %s1486_s0, 128, %s1329_s12, [#allocation3], %s1270_s21, %s1270_s21, %s1271_s22  }
  0x24   :  { %s1272_s14 = smov [#allocation7]   ;;  %s1273_s16 = smov [#allocation8]  }
  0x25   :  { %s47_s15 = sshll.u32 %s1272_s14, 4  ;;  %s61_s17 = sshll.u32 %s1273_s16, 4  ;;  %s48_s15 = int_to_ptr.vmem [resolvable:$true] %s47_s15  ;;  %s1366_s17 = int_to_ptr.vmem [resolvable:$true] %s61_s17 }
  0x26   :  { %s1194_s20 = scalar_lea.hbm %s1488_s2, 3072 }
  0x27   :  { %p1195_p2 = scmp.ne.s32.totalorder %s1488_s2, %s1194_s20  ;;  %p1198_p3 = scmp.lt.u32.totalorder %s1194_s20, %s1488_s2 }
  0x29   :  { %p1200_p4 = pnand %p1198_p3, %p1195_p2 }
  0x2b   :  { %1203 = shalt.err (!%p1200_p4)
}
  0x2c   :  { %s1204_s0 = scalar_lea.vmem %s48_s15, 3072  ;;  %p1209_p6 = scmp.lt.s32.totalorder %s48_s15, %s48_s15 }
  0x2d   :  { %p1205_p5 = scmp.ne.s32.totalorder %s48_s15, %s1204_s0  ;;  %p1210_p7 = scmp.lt.s32.totalorder %s1204_s0, %s1204_s0 }
  0x2f   :  { %p1211_p8 = por %p1210_p7, %p1209_p6 }
  0x31   :  { %p1212_p9 = pnand %p1211_p8, %p1205_p5 }
  0x33   :  { %1215 = shalt.err (!%p1212_p9)
}
  0x34   :  { %53 = dma.hbm_to_vmem [thread:$0]  %s1488_s2, 3072, %s48_s15, [#allocation6], %s1270_s21, %s1270_s21, %s1271_s22  }
  0x35   :  { %s1216_s30 = scalar_lea.hbm %s1490_s4, 128 }
  0x36   :  { %p1217_p10 = scmp.ne.s32.totalorder %s1490_s4, %s1216_s30  ;;  %p1220_p11 = scmp.lt.u32.totalorder %s1216_s30, %s1490_s4 }
  0x38   :  { %p1222_p12 = pnand %p1220_p11, %p1217_p10 }
  0x3a   :  { %1225 = shalt.err (!%p1222_p12)
}
  0x3b   :  { %s1226_s14 = scalar_lea.vmem %s1366_s17, 128  ;;  %p1231_p0 = scmp.lt.s32.totalorder %s1366_s17, %s1366_s17 }
  0x3c   :  { %p1227_p13 = scmp.ne.s32.totalorder %s1366_s17, %s1226_s14  ;;  %p1232_p1 = scmp.lt.s32.totalorder %s1226_s14, %s1226_s14 }
  0x3e   :  { %p1233_p2 = por %p1232_p1, %p1231_p0 }
  0x40   :  { %p1234_p3 = pnand %p1233_p2, %p1227_p13 }
  0x42   :  { %1237 = shalt.err (!%p1234_p3)
}
  0x43   :  { %67 = dma.hbm_to_vmem [thread:$0]  %s1490_s4, 128, %s1366_s17, [#allocation9], %s1270_s21, %s1270_s21, %s1271_s22  }
  0x44   :  { %1260 = dma.done.wait [#allocation3], 128  }
  0x45   :  { %1261 = vsyncadd [#allocation3], 4294967168 }
  0x46   :  { %1262 = dma.done.wait [#allocation6], 6144  }
  0x47   :  { %1263 = vsyncadd [#allocation6], 4294961152 }
  0x48   :  { %1264 = dma.done.wait [#allocation9], 128  }
  0x49   :  { %1265 = vsyncadd [#allocation9], 4294967168  ;;  %v1274_v0 = vmov 0.0   ;;  %vm1275_vm0 = vmmov 0   ;;  %v1409_v1 = vld [vmem:[#allocation2] sm:$0xff]   ;;  %v1102_v13 = vld [vmem:[#allocation5 + $0x40] sm:$0xff]  }
  0x4a   :  { %1025 = vmatprep.subr.bf16.mxu0 %v1274_v0  ;;  %1031 = vmatprep.subr.bf16.mxu1 %v1274_v0  ;;  %v893_v2 = vld [vmem:[%s1491_s5] ss:$0 sm:$0xff]  ;;  %v953_v3 = vunpack.c.l.bf16 %v1409_v1  ;;  %v954_v4 = vunpack.c.h.bf16 %v1409_v1  ;;  %v1428_v15 = vld [vmem:[#allocation8] sm:$0xff]   ;;  %vm123_vm1 = vcmask 130048   ;;  %v1105_v18 = vld [vmem:[#allocation5 + $0x48] sm:$0xff]  }
  0x4b   :  { %1027 = vmatprep.mubr.msk.bf16.mxu0 %vm1275_vm0, %v1274_v0  ;;  %1033 = vmatprep.mubr.msk.bf16.mxu1 %vm1275_vm0, %v1274_v0  ;;  %v894_v5 = vld [vmem:[%s1492_s6] ss:$0 sm:$0xff]  ;;  %v1103_v16 = vld [vmem:[#allocation5] sm:$0xff]   ;;  %v1106_v19 = vld [vmem:[#allocation5 + $0x8] sm:$0xff]  }
  0x4c   :  { %v104_v6 = vmul.f32 %v953_v3, %v893_v2  ;;  %v105_v7 = vmul.f32 %v954_v4, %v893_v2  ;;  %v1426_v12 = vld [vmem:[%s1489_s3] sm:$0xff]   ;;  %v1104_v17 = vld [vmem:[#allocation5 + $0x80] sm:$0xff]   ;;  %v1107_v20 = vld [vmem:[#allocation5 + $0x88] sm:$0xff]  }
  0x4d   :  { %v1108_v21 = vld [vmem:[#allocation5 + $0x50] sm:$0xff]   ;;  %v1111_v24 = vld [vmem:[#allocation5 + $0x58] sm:$0xff]   ;;  %v1114_v27 = vld [vmem:[#allocation5 + $0x60] sm:$0xff]  }
  0x4e   :  { %v113_v8 = vadd.f32 %v894_v5, %v104_v6  ;;  %v114_v9 = vadd.f32 %v894_v5, %v105_v7  ;;  %v1109_v22 = vld [vmem:[#allocation5 + $0x10] sm:$0xff]   ;;  %v1112_v25 = vld [vmem:[#allocation5 + $0x18] sm:$0xff]   ;;  %v1115_v28 = vld [vmem:[#allocation5 + $0x20] sm:$0xff]  }
  0x4f   :  { %v1110_v23 = vld [vmem:[#allocation5 + $0x90] sm:$0xff]   ;;  %v1113_v26 = vld [vmem:[#allocation5 + $0x98] sm:$0xff]   ;;  %v1116_v29 = vld [vmem:[#allocation5 + $0xa0] sm:$0xff]  }
  0x50   :  { %v115_v10 = vmax.f32 %v113_v8, 0.0  ;;  %v116_v11 = vmax.f32 %v114_v9, 0.0  ;;  %v1117_v30 = vld [vmem:[#allocation5 + $0x68] sm:$0xff]   ;;  %v1120_v33 = vld [vmem:[#allocation5 + $0x70] sm:$0xff]   ;;  %v1123_v36 = vld [vmem:[#allocation5 + $0x78] sm:$0xff]  }
  0x51   :  { %v1118_v31 = vld [vmem:[#allocation5 + $0x28] sm:$0xff]   ;;  %v1121_v34 = vld [vmem:[#allocation5 + $0x30] sm:$0xff]   ;;  %v1124_v37 = vld [vmem:[#allocation5 + $0x38] sm:$0xff]  }
  0x52   :  { %v117_v14 = vpack.c.bf16 %v116_v11, %v115_v10  ;;  %v1119_v32 = vld [vmem:[#allocation5 + $0xa8] sm:$0xff]   ;;  %v1122_v35 = vld [vmem:[#allocation5 + $0xb0] sm:$0xff]   ;;  %v1125_v38 = vld [vmem:[#allocation5 + $0xb8] sm:$0xff]  }
  0x53   :  { %v923_v56 = vld [vmem:[%s1493_s7] ss:$0 sm:$0xff]  ;;  %v1126_v9 = vld [vmem:[#allocation7 + $0x40] sm:$0xff]   ;;  %s1276_s7 = smov [#allocation10]  }
  0x54   :  { %1026 = vmatpush3.bf16.msra.mxu0 %v117_v14  ;;  %1032 = vmatpush3.bf16.msra.mxu1 %v117_v14  ;;  %v924_v61 = vld [vmem:[%s1494_s8] ss:$0 sm:$0xff]  ;;  %v1127_v11 = vld [vmem:[#allocation7] sm:$0xff]   ;;  %s879_s8 = sshll.u32 %s1276_s7, 4  ;;  %s880_s8 = int_to_ptr.vmem [resolvable:$true] %s879_s8 }
  0x55   :  { %959 = vmatprep.subr.bf16.mxu0 %v1102_v13  ;;  %1037 = vmatprep.subr.bf16.mxu1 %v1274_v0  ;;  %v1128_v13 = vld [vmem:[#allocation7 + $0x48] sm:$0xff]   ;;  %s1238_s20 = scalar_lea.vmem %s880_s8, 256  ;;  %p1243_p5 = scmp.lt.s32.totalorder %s880_s8, %s880_s8 }
  0x56   :  { %p1239_p4 = scmp.ne.s32.totalorder %s880_s8, %s1238_s20  ;;  %p1244_p6 = scmp.lt.s32.totalorder %s1238_s20, %s1238_s20 }
  0x57   :  { %1028 = vmatmul.mubr.msk.bf16.vlgmr.msra.gmra.mrb[0].mxu0 %vm123_vm1, %v1426_v12  ;;  %1034 = vmatmul.mubr.msk.bf16.vlgmr.msra.gmra.mrb[0].mxu1 %vm123_vm1, %v1428_v15 }
  0x58   :  { %960 = vmatpush3.bf16.msra.mxu0 %v1103_v16  ;;  %1038 = vmatpush3.bf16.msra.mxu1 %v1104_v17  ;;  %v1129_v16 = vld [vmem:[#allocation7 + $0x8] sm:$0xff]   ;;  %v1131_v17 = vld [vmem:[#allocation7 + $0x50] sm:$0xff]   ;;  %p1245_p7 = por %p1244_p6, %p1243_p5 }
  0x59   :  { %961 = vmatprep.subr.bf16.mxu0 %v1105_v18  ;;  %1039 = vmatprep.subr.bf16.mxu1 %v1274_v0  ;;  %v1133_v18 = vld [vmem:[#allocation7 + $0x88] sm:$0xff]  }
  0x5a   :  { %443 = vmatprep.mubr.bf16.mxu0 %v117_v14  ;;  %1053 = vmatprep.mubr.msk.bf16.mxu1 %vm1275_vm0, %v1274_v0  ;;  %v1130_v14 = vld [vmem:[#allocation7 + $0x80] sm:$0xff]   ;;  %p1246_p8 = pnand %p1245_p7, %p1239_p4 }
  0x5c   :  { %962 = vmatpush3.bf16.msra.mxu0 %v1106_v19  ;;  %1040 = vmatpush3.bf16.msra.mxu1 %v1107_v20  ;;  %v1132_v19 = vld [vmem:[#allocation7 + $0x10] sm:$0xff]  }
  0x5d   :  { %963 = vmatprep.subr.bf16.mxu0 %v1108_v21  ;;  %1041 = vmatprep.subr.bf16.mxu1 %v1274_v0  ;;  %v1136_v20 = vld [vmem:[#allocation7 + $0x90] sm:$0xff]   ;;  %v1137_v21 = vld [vmem:[#allocation7 + $0x60] sm:$0xff]  }
  0x60   :  { %964 = vmatpush3.bf16.msra.mxu0 %v1109_v22  ;;  %1042 = vmatpush3.bf16.msra.mxu1 %v1110_v23  ;;  %v1139_v22 = vld [vmem:[#allocation7 + $0x98] sm:$0xff]   ;;  %v1138_v23 = vld [vmem:[#allocation7 + $0x20] sm:$0xff]  }
  0x61   :  { %965 = vmatprep.subr.bf16.mxu0 %v1111_v24  ;;  %1043 = vmatprep.subr.bf16.mxu1 %v1274_v0  ;;  %v1140_v24 = vld [vmem:[#allocation7 + $0x68] sm:$0xff]  }
  0x64   :  { %966 = vmatpush3.bf16.msra.mxu0 %v1112_v25  ;;  %1044 = vmatpush3.bf16.msra.mxu1 %v1113_v26  ;;  %v1142_v25 = vld [vmem:[#allocation7 + $0xa0] sm:$0xff]   ;;  %v1141_v26 = vld [vmem:[#allocation7 + $0x28] sm:$0xff]  }
  0x65   :  { %967 = vmatprep.subr.bf16.mxu0 %v1114_v27  ;;  %1045 = vmatprep.subr.bf16.mxu1 %v1274_v0  ;;  %v1143_v27 = vld [vmem:[#allocation7 + $0x70] sm:$0xff]  }
  0x68   :  { %968 = vmatpush3.bf16.msra.mxu0 %v1115_v28  ;;  %1046 = vmatpush3.bf16.msra.mxu1 %v1116_v29  ;;  %v1145_v28 = vld [vmem:[#allocation7 + $0xa8] sm:$0xff]   ;;  %v1144_v29 = vld [vmem:[#allocation7 + $0x30] sm:$0xff]  }
  0x69   :  { %969 = vmatprep.subr.bf16.mxu0 %v1117_v30  ;;  %1047 = vmatprep.subr.bf16.mxu1 %v1274_v0  ;;  %v1148_v30 = vld [vmem:[#allocation7 + $0xb0] sm:$0xff]  }
  0x6c   :  { %970 = vmatpush3.bf16.msra.mxu0 %v1118_v31  ;;  %1048 = vmatpush3.bf16.msra.mxu1 %v1119_v32  ;;  %v1146_v31 = vld [vmem:[#allocation7 + $0x78] sm:$0xff]  }
  0x6d   :  { %971 = vmatprep.subr.bf16.mxu0 %v1120_v33  ;;  %1049 = vmatprep.subr.bf16.mxu1 %v1274_v0  ;;  %v1147_v32 = vld [vmem:[#allocation7 + $0x38] sm:$0xff]  }
  0x6e   :  { %v1149_v33 = vld [vmem:[#allocation7 + $0xb8] sm:$0xff]  }
  0x70   :  { %972 = vmatpush3.bf16.msra.mxu0 %v1121_v34  ;;  %1050 = vmatpush3.bf16.msra.mxu1 %v1122_v35 }
  0x71   :  { %1051 = vmatprep.subr.bf16.mxu1 %v1274_v0  ;;  %973 = vmatprep.subr.bf16.mxu0 %v1123_v36 }
  0x74   :  { %974 = vmatpush3.bf16.msra.mxu0 %v1124_v37  ;;  %1052 = vmatpush3.bf16.msra.mxu1 %v1125_v38 }
  0x75   :  { %1057 = vmatprep.subr.bf16.mxu0 %v1274_v0  ;;  %1063 = vmatprep.subr.bf16.mxu1 %v1274_v0 }
 0x12a   :  { %v161_v39 = vpop.f32.mrb[0].mxu0  ;;  %v211_v40 = vpop.f32.mrb[0].mxu1 }
 0x12b   :  { %v1029_v41 = vpop.f32.mrb[1].mxu0  ;;  %v1035_v42 = vpop.f32.mrb[1].mxu1 }
 0x12c   :  { %v164_v43 = vpop.f32.mrb[2].mxu0  ;;  %v214_v44 = vpop.f32.mrb[2].mxu1 }
 0x12d   :  { %v168_v45 = vpack.c.bf16 %v164_v43, %v161_v39  ;;  %v218_v46 = vpack.c.bf16 %v214_v44, %v211_v40  ;;  %v1030_v47 = vpop.f32.mrb[3].mxu0  ;;  %v1036_v48 = vpop.f32.mrb[3].mxu1 }
 0x12f   :  { %444 = vmatmul.mubr.bf16.vlgmr.msra.gmra.mrb[4].mxu0 %v168_v45  ;;  %1054 = vmatmul.mubr.bf16.vlgmr.msra.gmra.mrb[4].mxu1 %v218_v46 }
 0x130   :  { %1059 = vmatprep.mubr.msk.bf16.mxu0 %vm1275_vm0, %v1274_v0  ;;  %1065 = vmatprep.mubr.msk.bf16.mxu1 %vm1275_vm0, %v1274_v0 }
 0x202   :  { %v975_v49 = vpop.f32.mrb[4].mxu0  ;;  %v486_v50 = vpop.f32.mrb[4].mxu1 }
 0x203   :  { %v976_v51 = vpop.f32.mrb[5].mxu0  ;;  %v1055_v52 = vpop.f32.mrb[5].mxu1 }
 0x204   :  { %v977_v53 = vadd.f32 %v976_v51, %v975_v49  ;;  %v978_v54 = vpop.f32.mrb[6].mxu0  ;;  %v489_v55 = vpop.f32.mrb[6].mxu1 }
 0x205   :  { %v979_v57 = vpop.f32.mrb[7].mxu0  ;;  %v1056_v58 = vpop.f32.mrb[7].mxu1 }
 0x206   :  { %v487_v59 = vadd.f32 %v977_v53, %v486_v50  ;;  %v980_v60 = vadd.f32 %v979_v57, %v978_v54 }
 0x208   :  { %v500_v62 = vmul.f32 %v923_v56, %v487_v59  ;;  %v490_v63 = vadd.f32 %v980_v60, %v489_v55 }
 0x20a   :  { %v509_v2 = vadd.f32 %v924_v61, %v500_v62  ;;  %v501_v5 = vmul.f32 %v923_v56, %v490_v63 }
 0x20c   :  { %v510_v6 = vadd.f32 %v924_v61, %v501_v5  ;;  %v511_v7 = vmax.f32 %v509_v2, 0.0 }
 0x20e   :  { %v512_v8 = vmax.f32 %v510_v6, 0.0 }
 0x210   :  { %v513_v10 = vpack.c.bf16 %v512_v8, %v511_v7 }
 0x212   :  { %1058 = vmatpush3.bf16.msra.mxu0 %v513_v10  ;;  %1064 = vmatpush3.bf16.msra.mxu1 %v513_v10 }
 0x213   :  { %994 = vmatprep.subr.bf16.mxu0 %v1126_v9  ;;  %1069 = vmatprep.subr.bf16.mxu1 %v1274_v0 }
 0x215   :  { %1060 = vmatmul.mubr.msk.bf16.vlgmr.msra.gmra.mrb[8].mxu0 %vm123_vm1, %v1426_v12  ;;  %1066 = vmatmul.mubr.msk.bf16.vlgmr.msra.gmra.mrb[8].mxu1 %vm123_vm1, %v1428_v15  ;;  %v1134_v12 = vld [vmem:[#allocation7 + $0x58] sm:$0xff]  }
 0x216   :  { %822 = vmatprep.mubr.bf16.mxu0 %v513_v10  ;;  %995 = vmatpush3.bf16.msra.mxu0 %v1127_v11  ;;  %v1135_v15 = vld [vmem:[#allocation7 + $0x18] sm:$0xff]  }
 0x217   :  { %996 = vmatprep.subr.bf16.mxu0 %v1128_v13  ;;  %1070 = vmatpush3.bf16.msra.mxu1 %v1130_v14 }
 0x218   :  { %1071 = vmatprep.subr.bf16.mxu1 %v1274_v0  ;;  %1085 = vmatprep.mubr.msk.bf16.mxu1 %vm1275_vm0, %v1274_v0 }
 0x21a   :  { %997 = vmatpush3.bf16.msra.mxu0 %v1129_v16 }
 0x21b   :  { %998 = vmatprep.subr.bf16.mxu0 %v1131_v17  ;;  %1072 = vmatpush3.bf16.msra.mxu1 %v1133_v18 }
 0x21c   :  { %1073 = vmatprep.subr.bf16.mxu1 %v1274_v0 }
 0x21e   :  { %999 = vmatpush3.bf16.msra.mxu0 %v1132_v19 }
 0x21f   :  { %1000 = vmatprep.subr.bf16.mxu0 %v1134_v12  ;;  %1074 = vmatpush3.bf16.msra.mxu1 %v1136_v20 }
 0x220   :  { %1075 = vmatprep.subr.bf16.mxu1 %v1274_v0 }
 0x222   :  { %1001 = vmatpush3.bf16.msra.mxu0 %v1135_v15 }
 0x223   :  { %1002 = vmatprep.subr.bf16.mxu0 %v1137_v21  ;;  %1076 = vmatpush3.bf16.msra.mxu1 %v1139_v22 }
 0x224   :  { %1077 = vmatprep.subr.bf16.mxu1 %v1274_v0 }
 0x226   :  { %1003 = vmatpush3.bf16.msra.mxu0 %v1138_v23 }
 0x227   :  { %1004 = vmatprep.subr.bf16.mxu0 %v1140_v24  ;;  %1078 = vmatpush3.bf16.msra.mxu1 %v1142_v25 }
 0x228   :  { %1079 = vmatprep.subr.bf16.mxu1 %v1274_v0 }
 0x22a   :  { %1005 = vmatpush3.bf16.msra.mxu0 %v1141_v26 }
 0x22b   :  { %1006 = vmatprep.subr.bf16.mxu0 %v1143_v27  ;;  %1080 = vmatpush3.bf16.msra.mxu1 %v1145_v28 }
 0x22c   :  { %1081 = vmatprep.subr.bf16.mxu1 %v1274_v0 }
 0x22e   :  { %1007 = vmatpush3.bf16.msra.mxu0 %v1144_v29 }
 0x22f   :  { %1082 = vmatpush3.bf16.msra.mxu1 %v1148_v30  ;;  %1008 = vmatprep.subr.bf16.mxu0 %v1146_v31 }
 0x230   :  { %1083 = vmatprep.subr.bf16.mxu1 %v1274_v0 }
 0x232   :  { %1009 = vmatpush3.bf16.msra.mxu0 %v1147_v32 }
 0x233   :  { %1084 = vmatpush3.bf16.msra.mxu1 %v1149_v33 }
 0x2e8   :  { %v548_v34 = vpop.f32.mrb[8].mxu0  ;;  %v590_v35 = vpop.f32.mrb[8].mxu1 }
 0x2e9   :  { %v1061_v36 = vpop.f32.mrb[9].mxu0  ;;  %v1067_v37 = vpop.f32.mrb[9].mxu1 }
 0x2ea   :  { %v551_v38 = vpop.f32.mrb[10].mxu0  ;;  %v593_v39 = vpop.f32.mrb[10].mxu1 }
 0x2eb   :  { %v555_v40 = vpack.c.bf16 %v551_v38, %v548_v34  ;;  %v1062_v41 = vpop.f32.mrb[11].mxu0  ;;  %v597_v42 = vpack.c.bf16 %v593_v39, %v590_v35  ;;  %v1068_v43 = vpop.f32.mrb[11].mxu1 }
 0x2ed   :  { %823 = vmatmul.mubr.bf16.vlgmr.msra.gmra.mrb[12].mxu0 %v555_v40  ;;  %1086 = vmatmul.mubr.bf16.vlgmr.msra.gmra.mrb[12].mxu1 %v597_v42 }
 0x3c0   :  { %v1010_v44 = vpop.f32.mrb[12].mxu0  ;;  %v865_v45 = vpop.f32.mrb[12].mxu1 }
 0x3c1   :  { %v1011_v0 = vpop.f32.mrb[13].mxu0  ;;  %v1087_v46 = vpop.f32.mrb[13].mxu1 }
 0x3c2   :  { %v1012_v47 = vadd.f32 %v1011_v0, %v1010_v44  ;;  %v1013_v48 = vpop.f32.mrb[14].mxu0  ;;  %v868_v49 = vpop.f32.mrb[14].mxu1 }
 0x3c3   :  { %v1014_v50 = vpop.f32.mrb[15].mxu0  ;;  %v1088_v51 = vpop.f32.mrb[15].mxu1 }
 0x3c4   :  { %v1015_v52 = vadd.f32 %v1014_v50, %v1013_v48  ;;  %v825_v53 = vadd.f32 %v1012_v47, %v953_v3 }
 0x3c6   :  { %v866_v54 = vadd.f32 %v865_v45, %v825_v53  ;;  %v828_v55 = vadd.f32 %v1015_v52, %v954_v4 }
 0x3c8   :  { %872 = vst [vmem:[#allocation10] sm:$0xff] %v866_v54  ;;  %v869_v56 = vadd.f32 %v868_v49, %v828_v55 }
 0x3ca   :  { %873 = vst [vmem:[#allocation10 + $0x8] sm:$0xff] %v869_v56 }
 0x3cb   :  { %1249 = shalt.err (!%p1246_p8)
}
 0x3cc   :  { %s1250_s25 = scalar_lea.hbm %s1495_s9, 256 }
 0x3cd   :  { %p1251_p9 = scmp.ne.s32.totalorder %s1495_s9, %s1250_s25  ;;  %p1254_p10 = scmp.lt.u32.totalorder %s1250_s25, %s1495_s9 }
 0x3cf   :  { %p1256_p11 = pnand %p1254_p10, %p1251_p9 }
 0x3d1   :  { %1259 = shalt.err (!%p1256_p11)
}
 0x3d2   :  { %s1277_s28 = smov 128   ;;  %s1278_s29 = smov 8  }
 0x3d3   :  { %885 = dma.vmem_to_hbm [thread:$0]  %s880_s8, 256, %s1495_s9, [#allocation4], %s1277_s28, %s1277_s28, %s1278_s29  }
 0x3d4   :  { %1266 = dma.done.wait [#allocation4], 256  }
 0x3d5   :  { %1267 = vsyncadd [#allocation4], 4294967040 }
 0x3d6   :  { %889 = vsyncpa [#allocation3], 1 }
 0x3d7   :  { %890 = vsyncpa [#allocation6], 1 }
 0x3d8   :  { %891 = vsyncpa [#allocation9], 1 }
 0x3d9   :  { %892 = vsyncpa [#allocation4], 1 }

</bundles_post_ra>
